<compile_context>
chip_gen: v5e
topology: v5e:2x2
jax: 0.10.0
libtpu: 0.0.40
codegen_flags: <defaults>
</compile_context>

<pallas_src>
import functools

import jax
import jax.numpy as jnp
from jax.experimental import pallas as pl
from jax.experimental.pallas import tpu as pltpu


def _mlp_kernel(x_ref, *refs, n_layers):
    """Fused MLP forward for one batch tile, computed in transposed layout.

    x_ref : (TM, F)        activations, batch on sublanes / features on lanes
    refs  : w_0 .. w_{L-2} PyTorch-layout weights (d_out, d_in)
            w_last         last-layer weight as a column (d_in, 1)   [L >= 2]
            b_all          biases packed column-per-layer (max_out, L)
            o_ref          (1, TM) lane-dense output row
    """
    w_refs = refs[:n_layers]
    b_ref = refs[n_layers]
    o_ref = refs[n_layers + 1]

    param_dtype = w_refs[0].dtype

    # Layer 0: h = W0 @ x^T on the MXU — contract the feature axis of both
    # operands (rhs-transposed, like q @ k^T).  f32 accumulation.
    w0 = w_refs[0][...]
    d0 = w0.shape[0]
    h = jax.lax.dot_general(
        w0, x_ref[...].astype(param_dtype),
        dimension_numbers=(((1,), (1,)), ((), ())),
        preferred_element_type=jnp.float32)                 # (d0, TM), batch on lanes
    h = h + b_ref[:d0, 0:1].astype(jnp.float32)             # lane-broadcast bias

    if n_layers == 1:                                        # single Linear(n_inputs, 1)
        o_ref[...] = h.astype(o_ref.dtype)
        return

    # Fused ReLU + downcast: keeps inter-layer activations in the param dtype
    # (native bf16 VPU path on v6e/v7x; no-op for f32 params).
    h = jnp.maximum(h, 0.0).astype(param_dtype)

    # Middle hidden layers: standard (d_out, d_in) @ (d_in, TM) MXU matmuls.
    for i in range(1, n_layers - 1):
        w = w_refs[i][...]
        d = w.shape[0]
        h = jnp.dot(w, h, preferred_element_type=jnp.float32)
        h = h + b_ref[:d, i:i + 1].astype(jnp.float32)
        h = jnp.maximum(h, 0.0).astype(param_dtype)

    # Last layer (single output unit): broadcast-mul (VPU) + sublane reduce (XLU)
    # instead of a 1-useful-row MXU pass; result is already a lane-dense (1, TM) row.
    w_col = w_refs[n_layers - 1][...].astype(jnp.float32)              # (d_in, 1)
    b_last = b_ref[0:1, n_layers - 1:n_layers].astype(jnp.float32)     # (1, 1)
    out = jnp.sum(h.astype(jnp.float32) * w_col, axis=0, keepdims=True) + b_last
    o_ref[...] = out.astype(o_ref.dtype)


def _choose_tm(B, block_batch):
    """Batch-tile size.  Small B -> one full-batch block (block == array dims, so no
    (8,128) alignment constraints).  Otherwise a multiple of 128 (the batch sits on
    the lane axis of the output) with at least two grid steps so v7x's second
    TensorCore gets work and DMA/compute overlap kicks in."""
    if B < 256:
        return B
    tm = max(128, (min(block_batch, 2048) // 128) * 128)
    half = max(128, (((B + 1) // 2) // 128) * 128)
    return min(tm, half)


def init_mlp_params(key, n_inputs, n_hidden_units, n_layers, dtype=jnp.float32):
    """Deterministic init matching nn.Linear's U(-1/sqrt(fan_in), 1/sqrt(fan_in)).

    Returns a list of (W [out, in] (PyTorch layout), b [out]) pairs."""
    dims = []
    if n_layers == 1:
        dims.append((n_inputs, 1))
    else:
        for i in range(n_layers):
            if i == 0:
                dims.append((n_inputs, n_hidden_units))
            elif i == n_layers - 1:
                dims.append((n_hidden_units, 1))
            else:
                dims.append((n_hidden_units, n_hidden_units))
    params = []
    for (fan_in, fan_out) in dims:
        key, kw, kb = jax.random.split(key, 3)
        bound = 1.0 / (fan_in ** 0.5)
        w = jax.random.uniform(kw, (fan_out, fan_in), dtype, -bound, bound)
        b = jax.random.uniform(kb, (fan_out,), dtype, -bound, bound)
        params.append((w, b))
    return params


def mlp_forward(x, params, *, block_batch=1024):
    """Run the fused, batch-tiled Pallas MLP kernel.  x: [B, n_inputs] -> [B, 1]."""
    n_layers = len(params)
    B, F = x.shape
    out_dtype = x.dtype

    TM = _choose_tm(B, block_batch)
    grid = (pl.cdiv(B, TM),)
    # No wrapper-side jnp.pad: Pallas masks the boundary block's out-of-range
    # reads/writes and every batch column is independent, so no extra HBM pass.

    # Weights stay in PyTorch (out, in) layout; the last layer's (1, d_in) row is
    # fed as a (d_in, 1) column for the VPU/XLU epilogue.  All biases are packed
    # into one (max_out, n_layers) array (column i = layer i) to cut tiny DMAs.
    ws = [w for (w, _) in params]
    flat_ws = list(ws)
    if n_layers > 1:
        flat_ws[-1] = ws[-1].reshape(-1, 1)
    max_out = max(int(w.shape[0]) for w in ws)
    b_cols = []
    for (_, b) in params:
        col = b.reshape(-1, 1)
        b_cols.append(jnp.pad(col, ((0, max_out - col.shape[0]), (0, 0))))
    b_all = jnp.concatenate(b_cols, axis=1)                  # (max_out, n_layers)

    in_specs = [pl.BlockSpec((TM, F), lambda i: (i, 0))]     # batch-tiled activations
    for w in flat_ws:                                        # weights resident in VMEM
        in_specs.append(pl.BlockSpec(w.shape, lambda i: (0, 0)))
    in_specs.append(pl.BlockSpec(b_all.shape, lambda i: (0, 0)))   # resident biases

    out_specs = pl.BlockSpec((1, TM), lambda i: (0, i))      # lane-dense output rows
    out_shape = jax.ShapeDtypeStruct((1, B), out_dtype)

    # VMEM budget: resident weights (x2 for default double-buffering) + pipelined
    # activation/output buffers + f32 intermediates, with headroom.  Portable
    # across v5e's small scoped default and v7x's 64 MiB/TC.
    itemsize = jnp.dtype(out_dtype).itemsize
    weight_bytes = (sum(int(w.size) * w.dtype.itemsize for w in flat_ws)
                    + int(b_all.size) * b_all.dtype.itemsize)
    act_bytes = 2 * TM * F * x.dtype.itemsize + 2 * TM * itemsize
    interm_bytes = 4 * TM * max(max_out, F) * 4
    est = 2 * weight_bytes + act_bytes + interm_bytes
    vmem_limit = int(min(128 << 20, max(32 << 20, 2 * est)))
    # TODO(synk): for very wide hidden layers (resident weights >~ 24 MiB, half of
    # v7x's 64 MiB/TC) tile the hidden dims with an "arbitrary" K grid axis
    # instead of full weight residency; the module's widths here are tiny.

    flops = 2 * B * sum(int(w.shape[0]) * int(w.shape[1]) for w in ws)
    bytes_accessed = int(x.size) * x.dtype.itemsize + weight_bytes + B * itemsize
    cost = pl.CostEstimate(flops=flops, transcendentals=0,
                           bytes_accessed=bytes_accessed)

    kernel = functools.partial(_mlp_kernel, n_layers=n_layers)
    out = pl.pallas_call(
        kernel,
        out_shape=out_shape,
        grid=grid,
        in_specs=in_specs,
        out_specs=out_specs,
        compiler_params=pltpu.CompilerParams(
            dimension_semantics=("parallel",),   # v7x: batch tiles split across 2 TCs
            vmem_limit_bytes=vmem_limit),
        cost_estimate=cost,
    )(x, *flat_ws, b_all)
    return out.reshape(B, 1)


def mlp_reference(x, params):
    """Pure-JAX f32 reference for correctness checks (PyTorch-layout weights)."""
    h = x.astype(jnp.float32)
    for i, (w, b) in enumerate(params):
        h = h @ w.astype(jnp.float32).T + b.astype(jnp.float32)
        if i != len(params) - 1:
            h = jnp.maximum(h, 0.0)
    return h


if __name__ == "__main__":
    # Small shapes consistent with the module's forward: x is [batch, n_inputs].
    batch, n_inputs, n_hidden, n_layers = 64, 32, 32, 3

    key = jax.random.PRNGKey(0)
    k_params, k_x = jax.random.split(key)
    params = init_mlp_params(k_params, n_inputs, n_hidden, n_layers)
    x = jax.random.normal(k_x, (batch, n_inputs), jnp.float32)

    # 1) f32, small batch -> single full-batch tile.
    out = jax.block_until_ready(mlp_forward(x, params))
    ref = mlp_reference(x, params)
    assert out.shape == (batch, 1), out.shape
    assert jnp.allclose(out, ref, atol=1e-4, rtol=1e-4), "f32 mismatch vs reference"

    # 2) multi-step pipelined grid (3 tiles of 128): exercises v7x megacore split.
    x_big = jax.random.normal(k_x, (384, n_inputs), jnp.float32)
    out_big = jax.block_until_ready(mlp_forward(x_big, params, block_batch=128))
    ref_big = mlp_reference(x_big, params)
    assert jnp.allclose(out_big, ref_big, atol=1e-4, rtol=1e-4), "multi-tile mismatch"

    # 3) non-divisible batch -> boundary block masked in-kernel (no wrapper pad).
    x_odd = jax.random.normal(k_x, (300, n_inputs), jnp.float32)
    out_odd = jax.block_until_ready(mlp_forward(x_odd, params, block_batch=128))
    ref_odd = mlp_reference(x_odd, params)
    assert jnp.allclose(out_odd, ref_odd, atol=1e-4, rtol=1e-4), "boundary mismatch"

    # 4) bf16 params/activations: native bf16 MXU with f32 accumulation in-kernel.
    #    Intentional bf16 precision loss vs the f32 reference -> loose tolerance.
    params_bf16 = [(w.astype(jnp.bfloat16), b.astype(jnp.bfloat16)) for w, b in params]
    out_bf16 = jax.block_until_ready(mlp_forward(x.astype(jnp.bfloat16), params_bf16))
    assert out_bf16.shape == (batch, 1), out_bf16.shape
    assert jnp.allclose(out_bf16.astype(jnp.float32), ref, atol=1e-1, rtol=1e-1), \
        "bf16 mismatch vs reference"

    # 5) degenerate n_layers == 1 case: a single Linear(n_inputs, 1).
    params1 = init_mlp_params(k_params, n_inputs, n_hidden, 1)
    out1 = jax.block_until_ready(mlp_forward(x, params1))
    ref1 = mlp_reference(x, params1)
    assert jnp.allclose(out1, ref1, atol=1e-4, rtol=1e-4), "n_layers=1 mismatch"

    print("KERNEL_OK")
</pallas_src>

<mosaic_0001>
module attributes {stable_mosaic.version = 11 : i64} {
  func.func @_mlp_kernel(%arg0: i32, %arg1: memref<64x32xf32, #tpu.memory_space<vmem>>, %arg2: memref<32x32xf32, #tpu.memory_space<vmem>>, %arg3: memref<32x32xf32, #tpu.memory_space<vmem>>, %arg4: memref<32x1xf32, #tpu.memory_space<vmem>>, %arg5: memref<32x3xf32, #tpu.memory_space<vmem>>, %arg6: memref<1x64xf32, #tpu.memory_space<vmem>>) attributes {dimension_semantics = [#tpu.dimension_semantics<parallel>], iteration_bounds = array<i64: 1>, scalar_prefetch = 0 : i64, scratch_operands = 0 : i64, tpu.core_type = #tpu.core_type<tc>, window_params = [{transform_indices = @transform_0, window_bounds = array<i64: 64, 32>}, {pipeline_mode = #tpu.pipeline_mode<synchronous>, transform_indices = @transform_1, window_bounds = array<i64: 32, 32>}, {pipeline_mode = #tpu.pipeline_mode<synchronous>, transform_indices = @transform_2, window_bounds = array<i64: 32, 32>}, {pipeline_mode = #tpu.pipeline_mode<synchronous>, transform_indices = @transform_3, window_bounds = array<i64: 32, 1>}, {pipeline_mode = #tpu.pipeline_mode<synchronous>, transform_indices = @transform_4, window_bounds = array<i64: 32, 3>}, {transform_indices = @transform_5, window_bounds = array<i64: 1, 64>}]} {
    %c0 = arith.constant 0 : index
    %c0_0 = arith.constant 0 : index
    %0 = vector.load %arg2[%c0, %c0_0] : memref<32x32xf32, #tpu.memory_space<vmem>>, vector<32x32xf32>
    %c0_1 = arith.constant 0 : index
    %c0_2 = arith.constant 0 : index
    %1 = vector.load %arg1[%c0_1, %c0_2] : memref<64x32xf32, #tpu.memory_space<vmem>>, vector<64x32xf32>
    %cst = arith.constant dense<0.000000e+00> : vector<32x64xf32>
    %2 = tpu.matmul %0, %1, %cst {dimension_numbers = #tpu.dot_dimension_numbers<[1], [1], [0], [0], [0, 0, 1, 0], [], []>} : vector<32x32xf32>, vector<64x32xf32>, vector<32x64xf32> -> vector<32x64xf32>
    %c0_3 = arith.constant 0 : index
    %c0_4 = arith.constant 0 : index
    %3 = vector.load %arg5[%c0_3, %c0_4] : memref<32x3xf32, #tpu.memory_space<vmem>>, vector<32x1xf32>
    %4 = vector.broadcast %3 : vector<32x1xf32> to vector<32x64xf32>
    %5 = arith.addf %2, %4 : vector<32x64xf32>
    %cst_5 = arith.constant 0.000000e+00 : f32
    %6 = vector.broadcast %cst_5 : f32 to vector<32x64xf32>
    %7 = arith.maximumf %5, %6 : vector<32x64xf32>
    %c0_6 = arith.constant 0 : index
    %c0_7 = arith.constant 0 : index
    %8 = vector.load %arg3[%c0_6, %c0_7] : memref<32x32xf32, #tpu.memory_space<vmem>>, vector<32x32xf32>
    %cst_8 = arith.constant dense<0.000000e+00> : vector<32x64xf32>
    %9 = tpu.matmul %8, %7, %cst_8 {dimension_numbers = #tpu.dot_dimension_numbers<[1], [0], [0], [1], [0, 0, 1, 1], [], []>} : vector<32x32xf32>, vector<32x64xf32>, vector<32x64xf32> -> vector<32x64xf32>
    %c0_9 = arith.constant 0 : index
    %c1 = arith.constant 1 : index
    %10 = vector.load %arg5[%c0_9, %c1] : memref<32x3xf32, #tpu.memory_space<vmem>>, vector<32x1xf32>
    %11 = vector.broadcast %10 : vector<32x1xf32> to vector<32x64xf32>
    %12 = arith.addf %9, %11 : vector<32x64xf32>
    %cst_10 = arith.constant 0.000000e+00 : f32
    %13 = vector.broadcast %cst_10 : f32 to vector<32x64xf32>
    %14 = arith.maximumf %12, %13 : vector<32x64xf32>
    %c0_11 = arith.constant 0 : index
    %c0_12 = arith.constant 0 : index
    %15 = vector.load %arg4[%c0_11, %c0_12] : memref<32x1xf32, #tpu.memory_space<vmem>>, vector<32x1xf32>
    %c0_13 = arith.constant 0 : index
    %c2 = arith.constant 2 : index
    %16 = vector.load %arg5[%c0_13, %c2] : memref<32x3xf32, #tpu.memory_space<vmem>>, vector<1x1xf32>
    %17 = vector.broadcast %15 : vector<32x1xf32> to vector<32x64xf32>
    %18 = arith.mulf %14, %17 : vector<32x64xf32>
    %cst_14 = arith.constant dense<0.000000e+00> : vector<64xf32>
    %19 = vector.multi_reduction <add>, %18, %cst_14 [0] : vector<32x64xf32> to vector<64xf32>
    %20 = vector.shape_cast %19 : vector<64xf32> to vector<1x64xf32>
    %21 = vector.broadcast %16 : vector<1x1xf32> to vector<1x64xf32>
    %22 = arith.addf %20, %21 : vector<1x64xf32>
    %c0_15 = arith.constant 0 : index
    %c0_16 = arith.constant 0 : index
    %23 = vector.load %arg6[%c0_15, %c0_16] : memref<1x64xf32, #tpu.memory_space<vmem>>, vector<1x64xf32>
    tpu.vector_store %arg6[%c0_15, %c0_16], %22 {strides = array<i32>} : memref<1x64xf32, #tpu.memory_space<vmem>>, vector<1x64xf32>,
    return
  }
  func.func @transform_0(%arg0: i32) -> (i32, i32) {
    %c0_i32 = arith.constant 0 : i32
    %c0_i32_0 = arith.constant 0 : i32
    return %arg0, %c0_i32 : i32, i32
  }
  func.func @transform_1(%arg0: i32) -> (i32, i32) {
    %c0_i32 = arith.constant 0 : i32
    %c0_i32_0 = arith.constant 0 : i32
    %c0_i32_1 = arith.constant 0 : i32
    return %c0_i32, %c0_i32_0 : i32, i32
  }
  func.func @transform_2(%arg0: i32) -> (i32, i32) {
    %c0_i32 = arith.constant 0 : i32
    %c0_i32_0 = arith.constant 0 : i32
    %c0_i32_1 = arith.constant 0 : i32
    return %c0_i32, %c0_i32_0 : i32, i32
  }
  func.func @transform_3(%arg0: i32) -> (i32, i32) {
    %c0_i32 = arith.constant 0 : i32
    %c0_i32_0 = arith.constant 0 : i32
    %c0_i32_1 = arith.constant 0 : i32
    return %c0_i32, %c0_i32_0 : i32, i32
  }
  func.func @transform_4(%arg0: i32) -> (i32, i32) {
    %c0_i32 = arith.constant 0 : i32
    %c0_i32_0 = arith.constant 0 : i32
    %c0_i32_1 = arith.constant 0 : i32
    return %c0_i32, %c0_i32_0 : i32, i32
  }
  func.func @transform_5(%arg0: i32) -> (i32, i32) {
    %c0_i32 = arith.constant 0 : i32
    %c0_i32_0 = arith.constant 0 : i32
    return %c0_i32, %arg0 : i32, i32
  }
}

</mosaic_0001>

<bundles_post_ra>
// kernel: tpu_custom_call.1
= control target key start
LH: loop header
LB: loop body
LE: loop exit
PB: predicated region body
PF: predicated region fallthrough
CT: control target
= control target key end

     0   :  { %vm57_vm0 = vcmask 261120   ;;  %v331_v2 = vmov 0   ;;  %s480_s0 = inlined_call_operand.vmem [shape: f32[64,32], index: 0, kind: input, shape index: {}]   ;;  %s481_s1 = inlined_call_operand.vmem [shape: f32[32,32], index: 1, kind: input, shape index: {}]   ;;  %s482_s2 = inlined_call_operand.vmem [shape: f32[32,32], index: 2, kind: input, shape index: {}]   ;;  %s483_s3 = inlined_call_operand.vmem [shape: f32[32,1], index: 3, kind: input, shape index: {}]   ;;  %s484_s4 = inlined_call_operand.vmem [shape: f32[32,3], index: 4, kind: input, shape index: {}]   ;;  %s485_s5 = inlined_call_operand.hbm [shape: f32[1,64], index: 5, kind: output, shape index: {}]  }
   0x1   :  { %v32_v0 = vld [vmem:[%s480_s0 + $0x38] sm:$0xff]  ;;  %v31_v1 = vld [vmem:[%s480_s0 + $0x30] sm:$0xff]  ;;  %295 = vset.pattern.permute.xlu0 %v331_v2  ;;  %296 = vset.pattern.permute.xlu1 %v331_v2 }
   0x2   :  { %276 = vmatpush.xpose.msk.msra.mxu3 %vm57_vm0, %v32_v0  ;;  %275 = vmatpush.xpose.msk.msra.mxu2 %vm57_vm0, %v32_v0 }
   0x3   :  { %259 = vmatpush.xpose.msk.msra.mxu0 %vm57_vm0, %v32_v0 }
   0x4   :  { %10 = vsyncpa [#allocation3], 0  ;;  %v30_v3 = vld [vmem:[%s480_s0 + $0x28] sm:$0xff]  ;;  %v36_v4 = vld [vmem:[%s484_s4 + $0x18] sm:$0xff]  ;;  %v332_v18 = vmov 1   ;;  %v333_v37 = vmov 2  }
   0x5   :  { %v34_v5 = vld [vmem:[%s484_s4 + $0x8] sm:$0xff]  ;;  %v29_v6 = vld [vmem:[%s480_s0 + $0x20] sm:$0xff]  ;;  %54 = vperm.xlu0 %295, %v36_v4   ;;  %v28_v7 = vld [vmem:[%s480_s0 + $0x18] sm:$0xff]  ;;  %297 = vset.pattern.permute.xlu2 %v332_v18  ;;  %vm221_vm1 = vcmask 523264   ;;  %s250_s17 = sshll.u32 %s485_s5, 4  ;;  %vm241_vm2 = vcmask 516096   ;;  %s251_s17 = int_to_ptr.hbm [resolvable:$true] %s250_s17 }
   0x6   :  { %278 = vmatpush.xpose.msk.msra.mxu3 %vm57_vm0, %v31_v1  ;;  %277 = vmatpush.xpose.msk.msra.mxu2 %vm57_vm0, %v31_v1  ;;  %v35_v8 = vld [vmem:[%s484_s4 + $0x10] sm:$0xff]  ;;  %v33_v9 = vld [vmem:[%s484_s4] sm:$0xff]  ;;  %v26_v11 = vld [vmem:[%s480_s0 + $0x8] sm:$0xff] }
   0x7   :  { %260 = vmatpush.xpose.msk.msra.mxu0 %vm57_vm0, %v31_v1  ;;  %44 = vperm.xlu1 %296, %v34_v5   ;;  %v27_v10 = vld [vmem:[%s480_s0 + $0x10] sm:$0xff]  ;;  %v25_v12 = vld [vmem:[%s480_s0] sm:$0xff]  ;;  %v22_v14 = vld [vmem:[%s481_s1 + $0x8] sm:$0xff] }
   0x8   :  { %v23_v13 = vld [vmem:[%s481_s1 + $0x10] sm:$0xff]  ;;  %v21_v15 = vld [vmem:[%s481_s1] sm:$0xff]  ;;  %v24_v16 = vld [vmem:[%s481_s1 + $0x18] sm:$0xff]  ;;  %132 = vperm.xlu2 %297, %v33_v9  }
   0x9   :  { %v193_v21 = vld [vmem:[%s483_s3 + $0x8] sm:$0xff]  ;;  %v195_v31 = vld [vmem:[%s483_s3 + $0x18] sm:$0xff]  ;;  %v192_v32 = vld [vmem:[%s483_s3] sm:$0xff] }
   0xa   :  { %280 = vmatpush.xpose.msk.msra.mxu3 %vm57_vm0, %v30_v3  ;;  %279 = vmatpush.xpose.msk.msra.mxu2 %vm57_vm0, %v30_v3  ;;  %v196_v35 = vld [vmem:[%s484_s4] sm:$0x1]  ;;  %v194_v40 = vld [vmem:[%s483_s3 + $0x10] sm:$0xff]  ;;  %v128_v41 = vld [vmem:[%s482_s2 + $0x8] sm:$0xff] }
   0xb   :  { %261 = vmatpush.xpose.msk.msra.mxu0 %vm57_vm0, %v30_v3  ;;  %v127_v39 = vld [vmem:[%s482_s2] sm:$0xff]  ;;  %v129_v42 = vld [vmem:[%s482_s2 + $0x10] sm:$0xff]  ;;  %v130_v43 = vld [vmem:[%s482_s2 + $0x18] sm:$0xff]  ;;  %s334_s2 = smov [#allocation2]  }
   0xc   :  { %s248_s3 = sshll.u32 %s334_s2, 4  ;;  %s249_s3 = int_to_ptr.vmem [resolvable:$true] %s248_s3 }
   0xd   :  { %49 = vperm.xlu0 %295, %v35_v8  }
   0xe   :  { %282 = vmatpush.xpose.msk.msra.mxu3 %vm57_vm0, %v29_v6  ;;  %281 = vmatpush.xpose.msk.msra.mxu2 %vm57_vm0, %v29_v6 }
   0xf   :  { %262 = vmatpush.xpose.msk.msra.mxu0 %vm57_vm0, %v29_v6  ;;  %39 = vperm.xlu1 %296, %v33_v9  }
  0x10   :  { %136 = vperm.xlu2 %297, %v34_v5  }
  0x12   :  { %284 = vmatpush.xpose.msk.msra.mxu3 %vm57_vm0, %v28_v7  ;;  %283 = vmatpush.xpose.msk.msra.mxu2 %vm57_vm0, %v28_v7 }
  0x13   :  { %263 = vmatpush.xpose.msk.msra.mxu0 %vm57_vm0, %v28_v7 }
  0x15   :  { %298 = vset.pattern.permute.xlu0 %v332_v18 }
  0x16   :  { %286 = vmatpush.xpose.msk.msra.mxu3 %vm57_vm0, %v27_v10  ;;  %285 = vmatpush.xpose.msk.msra.mxu2 %vm57_vm0, %v27_v10 }
  0x17   :  { %264 = vmatpush.xpose.msk.msra.mxu0 %vm57_vm0, %v27_v10  ;;  %299 = vset.pattern.permute.xlu1 %v332_v18 }
  0x18   :  { %144 = vperm.xlu1 %299, %v36_v4   ;;  %140 = vperm.xlu0 %298, %v35_v8  }
  0x19   :  { %300 = vset.pattern.permute.xlu2 %v331_v2 }
  0x1a   :  { %288 = vmatpush.xpose.msk.msra.mxu3 %vm57_vm0, %v26_v11  ;;  %287 = vmatpush.xpose.msk.msra.mxu2 %vm57_vm0, %v26_v11 }
  0x1b   :  { %265 = vmatpush.xpose.msk.msra.mxu0 %vm57_vm0, %v26_v11  ;;  %199 = vperm.xlu2 %300, %v192_v32  }
  0x1e   :  { %290 = vmatpush.xpose.msk.msra.mxu3 %vm57_vm0, %v25_v12  ;;  %289 = vmatpush.xpose.msk.msra.mxu2 %vm57_vm0, %v25_v12 }
  0x1f   :  { %266 = vmatpush.xpose.msk.msra.mxu0 %vm57_vm0, %v25_v12 }
  0x20   :  { %301 = vset.pattern.permute.xlu1 %v331_v2  ;;  %302 = vset.pattern.permute.xlu0 %v331_v2 }
  0x21   :  { %269 = vmatmul.msk.f32.vlgmr.msra.gmra.mxu3 %vm57_vm0, %v23_v13  ;;  %268 = vmatmul.msk.f32.vlgmr.msra.gmra.mxu2 %vm57_vm0, %v22_v14 }
  0x22   :  { %267 = vmatmul.msk.f32.vlgmr.msra.gmra.mxu0 %vm57_vm0, %v21_v15  ;;  %204 = vperm.xlu1 %301, %v193_v21  }
  0x23   :  { %214 = vperm.xlu0 %302, %v195_v31   ;;  %209 = vperm.xlu2 %300, %v194_v40  }
  0x29   :  { %270 = vmatmul.msk.f32.gmra.mxu3 %vm57_vm0, %v24_v16 }
  0x2a   :  { %303 = vset.pattern.permute.xlu1 %v333_v37 }
  0x2b   :  { %237 = vperm.xlu1 %303, %v196_v35   ;;  %304 = vset.pattern.permute.xlu0 %v333_v37 }
  0x62   :  { %v133_v44 = vpop.permute.xlu2 %132 }
  0x6a   :  { %v137_v46 = vpop.permute.xlu2 %136 }
  0x75   :  { %v200_v50 = vpop.permute.xlu2 %199 }
  0x77   :  { %v55_v17 = vpop.permute.xlu0 %54 }
  0x79   :  { %v45_v19 = vpop.permute.xlu1 %44 }
  0x7d   :  { %v210_v60 = vpop.permute.xlu2 %209 }
  0x7f   :  { %v50_v22 = vpop.permute.xlu0 %49 }
  0x81   :  { %v40_v27 = vpop.permute.xlu1 %39 }
  0x8a   :  { %v145_v47 = vpop.permute.xlu1 %144  ;;  %v141_v51 = vpop.permute.xlu0 %140 }
  0x94   :  { %v205_v56 = vpop.permute.xlu1 %204 }
  0x95   :  { %v215_v2 = vpop.permute.xlu0 %214 }
  0x9d   :  { %v238_v16 = vpop.permute.xlu1 %237 }
  0x9f   :  { %v111_v28 = vpop.f32.mrf.mxu0 }
  0xa0   :  { %v112_v34 = vadd.f32 %v111_v28, %v40_v27 }
  0xa2   :  { %v123_v38 = vmax.f32 %v112_v34, 0.0 }
  0xa4   :  { %v117_v20 = vpop.f32.mrf.mxu3  ;;  %v114_v23 = vpop.f32.mrf.mxu2 }
  0xa5   :  { %v118_v25 = vadd.f32 %v117_v20, %v50_v22  ;;  %v115_v29 = vadd.f32 %v114_v23, %v45_v19 }
  0xa7   :  { %v125_v33 = vmax.f32 %v118_v25, 0.0  ;;  %v124_v36 = vmax.f32 %v115_v29, 0.0 }
  0xac   :  { %v120_v24 = vpop.f32.mrf.mxu3 }
  0xad   :  { %v121_v26 = vadd.f32 %v120_v24, %v55_v17 }
  0xaf   :  { %v126_v30 = vmax.f32 %v121_v26, 0.0 }
  0xb1   :  { %171 = vmatpush.msra.mxu1 %v126_v30 }
  0xb3   :  { %172 = vmatpush.msra.mxu1 %v125_v33 }
  0xb5   :  { %173 = vmatpush.msra.mxu1 %v124_v36 }
  0xb7   :  { %174 = vmatpush.msra.mxu1 %v123_v38 }
  0xb8   :  { %271 = vmatmul.msk.f32.vlgmr.msra.gmra.mxu1 %vm57_vm0, %v127_v39 }
  0xc0   :  { %272 = vmatmul.msk.f32.gmra.mxu1 %vm57_vm0, %v128_v41 }
  0xc8   :  { %273 = vmatmul.msk.f32.gmra.mxu1 %vm57_vm0, %v129_v42 }
  0xd0   :  { %274 = vmatmul.msk.f32.gmra.mxu1 %vm57_vm0, %v130_v43 }
 0x135   :  { %v176_v45 = vpop.f32.mrf.mxu1 }
 0x136   :  { %v177_v52 = vadd.f32 %v176_v45, %v133_v44 }
 0x138   :  { %v188_v57 = vmax.f32 %v177_v52, 0.0 }
 0x13a   :  { %v217_v61 = vmul.f32 %v200_v50, %v188_v57 }
 0x13c   :  { %v222_v3 = vsel %vm221_vm1, %v217_v61, 0.0 }
 0x13d   :  { %v179_v48 = vpop.f32.mrf.mxu1 }
 0x13e   :  { %v180_v49 = vadd.f32 %v179_v48, %v137_v46 }
 0x140   :  { %v189_v54 = vmax.f32 %v180_v49, 0.0 }
 0x142   :  { %v218_v59 = vmul.f32 %v205_v56, %v189_v54 }
 0x144   :  { %v223_v0 = vsel %vm221_vm1, %v218_v59, 0.0 }
 0x145   :  { %v182_v53 = vpop.f32.mrf.mxu1  ;;  %v224_v6 = vadd.f32 %v223_v0, %v222_v3 }
 0x146   :  { %v183_v55 = vadd.f32 %v182_v53, %v141_v51 }
 0x148   :  { %v190_v58 = vmax.f32 %v183_v55, 0.0 }
 0x14a   :  { %v219_v62 = vmul.f32 %v210_v60, %v190_v58 }
 0x14c   :  { %v225_v4 = vsel %vm221_vm1, %v219_v62, 0.0 }
 0x14d   :  { %v185_v63 = vpop.f32.mrf.mxu1  ;;  %v226_v8 = vadd.f32 %v225_v4, %v224_v6 }
 0x14e   :  { %v186_v1 = vadd.f32 %v185_v63, %v145_v47 }
 0x150   :  { %v191_v5 = vmax.f32 %v186_v1, 0.0 }
 0x152   :  { %v220_v7 = vmul.f32 %v215_v2, %v191_v5 }
 0x154   :  { %v227_v9 = vsel %vm221_vm1, %v220_v7, 0.0 }
 0x155   :  { %v228_v10 = vadd.f32 %v227_v9, %v226_v8 }
 0x157   :  { %v229_v11 = vrot.slane %v228_v10, 4 }
 0x159   :  { %v230_v12 = vadd.f32 %v229_v11, %v228_v10 }
 0x15b   :  { %v231_v13 = vrot.slane %v230_v12, 2 }
 0x15d   :  { %v232_v14 = vadd.f32 %v231_v13, %v230_v12 }
 0x15f   :  { %v233_v15 = vrot.slane %v232_v14, 1 }
 0x161   :  { %v234_v17 = vadd.f32 %v233_v15, %v232_v14 }
 0x163   :  { %v240_v18 = vadd.f32 %v238_v16, %v234_v17 }
 0x165   :  { %242 = vst.msk [vmem:[#allocation2] sm:$0x1] %vm241_vm2, %v240_v18 }
 0x166   :  { %253 = dma.vmem_to_hbm [thread:$0]  %s249_s3, 16, %s251_s17, [#allocation3]  }
 0x167   :  { %329 = dma.done.wait [#allocation3], 16  }
 0x168   :  { %330 = vsyncadd [#allocation3], 4294967280 }
 0x169   :  { %258 = vsyncpa [#allocation3], 1 }

</bundles_post_ra>
